<compile_context>
chip_gen: v6e
topology: v6e:2x2x1
jax: 0.10.0
libtpu: 0.0.40
codegen_flags: <defaults>
</compile_context>

<pallas_src>
import jax
import jax.numpy as jnp
from jax.experimental import pallas as pl
from jax.experimental.pallas import tpu as pltpu


def _round_up(n: int, m: int) -> int:
    return ((n + m - 1) // m) * m


def mlp_kernel(alphas_ref,                      # SMEM (2,) f32: [alpha1, alpha2]
               x_ref, w1_ref, b1_ref, w2_ref, b2_ref, w3_ref, b3_ref,
               o_ref):
    """Fused 3-layer MLP forward for one batch tile.

    PReLU (single shared alpha, PyTorch default num_parameters=1):
        prelu(h) = h if h >= 0 else alpha * h
    """
    a1 = alphas_ref[0]
    a2 = alphas_ref[1]

    x = x_ref[...]

    # Layer 1: Linear + (Dropout = identity in eval) + PReLU
    h = jnp.dot(x.astype(w1_ref.dtype), w1_ref[...],
                preferred_element_type=jnp.float32) + b1_ref[...]
    h = jnp.where(h >= 0, h, a1 * h)

    # Layer 2: Linear + (Dropout = identity in eval) + PReLU
    h = jnp.dot(h.astype(w2_ref.dtype), w2_ref[...],
                preferred_element_type=jnp.float32) + b2_ref[...]
    h = jnp.where(h >= 0, h, a2 * h)

    # Layer 3: Linear (output head)
    out = jnp.dot(h.astype(w3_ref.dtype), w3_ref[...],
                  preferred_element_type=jnp.float32) + b3_ref[...]
    o_ref[...] = out.astype(o_ref.dtype)


def mlp_forward(x, params, *, block_b: int = 128):
    """x: [B, input_dim] float32.  params: dict of weights/biases/alphas.

    Weights may be f32 or bf16 ([in, out] layout, i.e. transposed vs PyTorch);
    biases and alphas are kept f32 for the elementwise epilogue.
    """
    w1, b1, a1 = params["w1"], params["b1"], params["a1"]
    w2, b2, a2 = params["w2"], params["b2"], params["a2"]
    w3, b3 = params["w3"], params["b3"]

    B, input_dim = x.shape
    hidden_dim = w1.shape[1]
    output_dim = w3.shape[1]

    # Lane-dense padding for hidden / output feature dims (multiples of 128).
    HP = _round_up(hidden_dim, 128)
    OP = _round_up(output_dim, 128)

    # Batch tile: multiple of 8 sublanes, capped by block_b.
    TB = min(_round_up(block_b, 8), _round_up(B, 8))
    BP = _round_up(B, TB)

    f32 = jnp.float32
    xp = x if BP == B else jnp.pad(x, ((0, BP - B), (0, 0)))
    w1p = jnp.pad(w1, ((0, 0), (0, HP - hidden_dim)))
    b1p = jnp.pad(b1.reshape(1, -1).astype(f32), ((0, 0), (0, HP - hidden_dim)))
    w2p = jnp.pad(w2, ((0, HP - hidden_dim), (0, HP - hidden_dim)))
    b2p = jnp.pad(b2.reshape(1, -1).astype(f32), ((0, 0), (0, HP - hidden_dim)))
    w3p = jnp.pad(w3, ((0, HP - hidden_dim), (0, OP - output_dim)))
    b3p = jnp.pad(b3.reshape(1, -1).astype(f32), ((0, 0), (0, OP - output_dim)))
    alphas = jnp.concatenate(
        [jnp.asarray(a1, f32).reshape(-1), jnp.asarray(a2, f32).reshape(-1)])

    grid = (BP // TB,)

    def const(shape):
        # Weights/biases: same block every grid step -> stay VMEM-resident.
        return pl.BlockSpec(shape, lambda i: (0, 0))

    out_padded = pl.pallas_call(
        mlp_kernel,
        out_shape=jax.ShapeDtypeStruct((BP, OP), x.dtype),
        grid_spec=pltpu.PrefetchScalarGridSpec(
            num_scalar_prefetch=0,
            grid=grid,
            in_specs=[
                pl.BlockSpec(memory_space=pltpu.MemorySpace.SMEM),  # alphas
                pl.BlockSpec((TB, input_dim), lambda i: (i, 0)),    # x tile
                const((input_dim, HP)),                             # w1
                const((1, HP)),                                     # b1
                const((HP, HP)),                                    # w2
                const((1, HP)),                                     # b2
                const((HP, OP)),                                    # w3
                const((1, OP)),                                     # b3
            ],
            out_specs=pl.BlockSpec((TB, OP), lambda i: (i, 0)),
        ),
        compiler_params=pltpu.CompilerParams(
            dimension_semantics=("parallel",)),
    )(alphas, xp, w1p, b1p, w2p, b2p, w3p, b3p)

    return out_padded[:B, :output_dim]


def init_params(key, input_dim, hidden_dim, output_dim, weight_dtype=jnp.float32):
    """Deterministic init mimicking PyTorch nn.Linear (uniform +/- 1/sqrt(fan_in))
    and nn.PReLU (alpha = 0.25).  Weights stored [in, out]."""
    keys = jax.random.split(key, 6)

    def linear(kw, kb, fan_in, fan_out):
        bound = 1.0 / jnp.sqrt(fan_in)
        w = jax.random.uniform(kw, (fan_in, fan_out), jnp.float32, -bound, bound)
        b = jax.random.uniform(kb, (1, fan_out), jnp.float32, -bound, bound)
        return w.astype(weight_dtype), b

    w1, b1 = linear(keys[0], keys[1], input_dim, hidden_dim)
    w2, b2 = linear(keys[2], keys[3], hidden_dim, hidden_dim)
    w3, b3 = linear(keys[4], keys[5], hidden_dim, output_dim)
    a1 = jnp.full((1, 1), 0.25, jnp.float32)
    a2 = jnp.full((1, 1), 0.25, jnp.float32)
    return {"w1": w1, "b1": b1, "a1": a1,
            "w2": w2, "b2": b2, "a2": a2,
            "w3": w3, "b3": b3}


def mlp_reference(x, p):
    """Pure-JAX reference (full-precision dots) for correctness check."""
    def dot(a, b):
        return jnp.dot(a.astype(jnp.float32), b.astype(jnp.float32),
                       precision=jax.lax.Precision.HIGHEST,
                       preferred_element_type=jnp.float32)
    h = dot(x, p["w1"]) + p["b1"]
    h = jnp.where(h >= 0, h, p["a1"].reshape(()) * h)
    h = dot(h, p["w2"]) + p["b2"]
    h = jnp.where(h >= 0, h, p["a2"].reshape(()) * h)
    return dot(h, p["w3"]) + p["b3"]


if __name__ == "__main__":
    input_dim, hidden_dim, output_dim = 32, 64, 16

    key = jax.random.PRNGKey(0)
    k_params, k_x, k_x2 = jax.random.split(key, 3)
    params = init_params(k_params, input_dim, hidden_dim, output_dim)

    # Small case (module-scale shapes): single 8-row tile.
    x = jax.random.normal(k_x, (8, input_dim), jnp.float32)
    out = jax.block_until_ready(mlp_forward(x, params))
    ref = mlp_reference(x, params)
    assert out.shape == (8, output_dim)
    assert jnp.allclose(out, ref, atol=1e-4, rtol=1e-4), "mismatch vs reference (small)"

    # Larger, non-divisible batch to exercise the tiled 'parallel' grid + padding.
    x2 = jax.random.normal(k_x2, (300, input_dim), jnp.float32)
    out2 = jax.block_until_ready(mlp_forward(x2, params, block_b=128))
    ref2 = mlp_reference(x2, params)
    assert out2.shape == (300, output_dim)
    assert jnp.allclose(out2, ref2, atol=1e-4, rtol=1e-4), "mismatch vs reference (tiled)"

    print("KERNEL_OK")
</pallas_src>

<mosaic_0001>
module attributes {stable_mosaic.version = 11 : i64} {
  func.func @mlp_kernel(%arg0: i32, %arg1: memref<2xf32, #tpu.memory_space<smem>>, %arg2: memref<8x32xf32, #tpu.memory_space<vmem>>, %arg3: memref<32x128xf32, #tpu.memory_space<vmem>>, %arg4: memref<1x128xf32, #tpu.memory_space<vmem>>, %arg5: memref<128x128xf32, #tpu.memory_space<vmem>>, %arg6: memref<1x128xf32, #tpu.memory_space<vmem>>, %arg7: memref<128x128xf32, #tpu.memory_space<vmem>>, %arg8: memref<1x128xf32, #tpu.memory_space<vmem>>, %arg9: memref<8x128xf32, #tpu.memory_space<vmem>>) attributes {dimension_semantics = [#tpu.dimension_semantics<parallel>], iteration_bounds = array<i64: 1>, scalar_prefetch = 0 : i64, scratch_operands = 0 : i64, tpu.core_type = #tpu.core_type<tc>, window_params = [{transform_indices = @transform_0, window_bounds = array<i64: 2>}, {transform_indices = @transform_1, window_bounds = array<i64: 8, 32>}, {pipeline_mode = #tpu.pipeline_mode<synchronous>, transform_indices = @transform_2, window_bounds = array<i64: 32, 128>}, {pipeline_mode = #tpu.pipeline_mode<synchronous>, transform_indices = @transform_3, window_bounds = array<i64: 1, 128>}, {pipeline_mode = #tpu.pipeline_mode<synchronous>, transform_indices = @transform_4, window_bounds = array<i64: 128, 128>}, {pipeline_mode = #tpu.pipeline_mode<synchronous>, transform_indices = @transform_5, window_bounds = array<i64: 1, 128>}, {pipeline_mode = #tpu.pipeline_mode<synchronous>, transform_indices = @transform_6, window_bounds = array<i64: 128, 128>}, {pipeline_mode = #tpu.pipeline_mode<synchronous>, transform_indices = @transform_7, window_bounds = array<i64: 1, 128>}, {transform_indices = @transform_8, window_bounds = array<i64: 8, 128>}]} {
    %c0 = arith.constant 0 : index
    %0 = memref.load %arg1[%c0] : memref<2xf32, #tpu.memory_space<smem>>
    %c1 = arith.constant 1 : index
    %1 = memref.load %arg1[%c1] : memref<2xf32, #tpu.memory_space<smem>>
    %c0_0 = arith.constant 0 : index
    %c0_1 = arith.constant 0 : index
    %2 = vector.load %arg2[%c0_0, %c0_1] : memref<8x32xf32, #tpu.memory_space<vmem>>, vector<8x32xf32>
    %c0_2 = arith.constant 0 : index
    %c0_3 = arith.constant 0 : index
    %3 = vector.load %arg3[%c0_2, %c0_3] : memref<32x128xf32, #tpu.memory_space<vmem>>, vector<32x128xf32>
    %cst = arith.constant dense<0.000000e+00> : vector<8x128xf32>
    %4 = tpu.matmul %2, %3, %cst {dimension_numbers = #tpu.dot_dimension_numbers<[1], [0], [0], [1], [0, 0, 1, 1], [], []>} : vector<8x32xf32>, vector<32x128xf32>, vector<8x128xf32> -> vector<8x128xf32>
    %c0_4 = arith.constant 0 : index
    %c0_5 = arith.constant 0 : index
    %5 = vector.load %arg4[%c0_4, %c0_5] : memref<1x128xf32, #tpu.memory_space<vmem>>, vector<1x128xf32>
    %6 = vector.broadcast %5 : vector<1x128xf32> to vector<8x128xf32>
    %7 = arith.addf %4, %6 : vector<8x128xf32>
    %cst_6 = arith.constant 0.000000e+00 : f32
    %8 = vector.broadcast %cst_6 : f32 to vector<8x128xf32>
    %9 = arith.cmpf oge, %7, %8 : vector<8x128xf32>
    %10 = vector.broadcast %0 : f32 to vector<8x128xf32>
    %11 = arith.mulf %10, %7 : vector<8x128xf32>
    %12 = arith.select %9, %7, %11 : vector<8x128xi1>, vector<8x128xf32>
    %c0_7 = arith.constant 0 : index
    %c0_8 = arith.constant 0 : index
    %13 = vector.load %arg5[%c0_7, %c0_8] : memref<128x128xf32, #tpu.memory_space<vmem>>, vector<128x128xf32>
    %cst_9 = arith.constant dense<0.000000e+00> : vector<8x128xf32>
    %14 = tpu.matmul %12, %13, %cst_9 {dimension_numbers = #tpu.dot_dimension_numbers<[1], [0], [0], [1], [0, 0, 1, 1], [], []>} : vector<8x128xf32>, vector<128x128xf32>, vector<8x128xf32> -> vector<8x128xf32>
    %c0_10 = arith.constant 0 : index
    %c0_11 = arith.constant 0 : index
    %15 = vector.load %arg6[%c0_10, %c0_11] : memref<1x128xf32, #tpu.memory_space<vmem>>, vector<1x128xf32>
    %16 = vector.broadcast %15 : vector<1x128xf32> to vector<8x128xf32>
    %17 = arith.addf %14, %16 : vector<8x128xf32>
    %cst_12 = arith.constant 0.000000e+00 : f32
    %18 = vector.broadcast %cst_12 : f32 to vector<8x128xf32>
    %19 = arith.cmpf oge, %17, %18 : vector<8x128xf32>
    %20 = vector.broadcast %1 : f32 to vector<8x128xf32>
    %21 = arith.mulf %20, %17 : vector<8x128xf32>
    %22 = arith.select %19, %17, %21 : vector<8x128xi1>, vector<8x128xf32>
    %c0_13 = arith.constant 0 : index
    %c0_14 = arith.constant 0 : index
    %23 = vector.load %arg7[%c0_13, %c0_14] : memref<128x128xf32, #tpu.memory_space<vmem>>, vector<128x128xf32>
    %cst_15 = arith.constant dense<0.000000e+00> : vector<8x128xf32>
    %24 = tpu.matmul %22, %23, %cst_15 {dimension_numbers = #tpu.dot_dimension_numbers<[1], [0], [0], [1], [0, 0, 1, 1], [], []>} : vector<8x128xf32>, vector<128x128xf32>, vector<8x128xf32> -> vector<8x128xf32>
    %c0_16 = arith.constant 0 : index
    %c0_17 = arith.constant 0 : index
    %25 = vector.load %arg8[%c0_16, %c0_17] : memref<1x128xf32, #tpu.memory_space<vmem>>, vector<1x128xf32>
    %26 = vector.broadcast %25 : vector<1x128xf32> to vector<8x128xf32>
    %27 = arith.addf %24, %26 : vector<8x128xf32>
    %c0_18 = arith.constant 0 : index
    %c0_19 = arith.constant 0 : index
    %28 = vector.load %arg9[%c0_18, %c0_19] : memref<8x128xf32, #tpu.memory_space<vmem>>, vector<8x128xf32>
    tpu.vector_store %arg9[%c0_18, %c0_19], %27 {strides = array<i32>} : memref<8x128xf32, #tpu.memory_space<vmem>>, vector<8x128xf32>,
    return
  }
  func.func @transform_0(%arg0: i32) -> i32 {
    %c0_i32 = arith.constant 0 : i32
    %c0_i32_0 = arith.constant 0 : i32
    return %c0_i32 : i32
  }
  func.func @transform_1(%arg0: i32) -> (i32, i32) {
    %c0_i32 = arith.constant 0 : i32
    %c0_i32_0 = arith.constant 0 : i32
    return %arg0, %c0_i32 : i32, i32
  }
  func.func @transform_2(%arg0: i32) -> (i32, i32) {
    %c0_i32 = arith.constant 0 : i32
    %c0_i32_0 = arith.constant 0 : i32
    %c0_i32_1 = arith.constant 0 : i32
    return %c0_i32, %c0_i32_0 : i32, i32
  }
  func.func @transform_3(%arg0: i32) -> (i32, i32) {
    %c0_i32 = arith.constant 0 : i32
    %c0_i32_0 = arith.constant 0 : i32
    %c0_i32_1 = arith.constant 0 : i32
    return %c0_i32, %c0_i32_0 : i32, i32
  }
  func.func @transform_4(%arg0: i32) -> (i32, i32) {
    %c0_i32 = arith.constant 0 : i32
    %c0_i32_0 = arith.constant 0 : i32
    %c0_i32_1 = arith.constant 0 : i32
    return %c0_i32, %c0_i32_0 : i32, i32
  }
  func.func @transform_5(%arg0: i32) -> (i32, i32) {
    %c0_i32 = arith.constant 0 : i32
    %c0_i32_0 = arith.constant 0 : i32
    %c0_i32_1 = arith.constant 0 : i32
    return %c0_i32, %c0_i32_0 : i32, i32
  }
  func.func @transform_6(%arg0: i32) -> (i32, i32) {
    %c0_i32 = arith.constant 0 : i32
    %c0_i32_0 = arith.constant 0 : i32
    %c0_i32_1 = arith.constant 0 : i32
    return %c0_i32, %c0_i32_0 : i32, i32
  }
  func.func @transform_7(%arg0: i32) -> (i32, i32) {
    %c0_i32 = arith.constant 0 : i32
    %c0_i32_0 = arith.constant 0 : i32
    %c0_i32_1 = arith.constant 0 : i32
    return %c0_i32, %c0_i32_0 : i32, i32
  }
  func.func @transform_8(%arg0: i32) -> (i32, i32) {
    %c0_i32 = arith.constant 0 : i32
    %c0_i32_0 = arith.constant 0 : i32
    return %arg0, %c0_i32 : i32, i32
  }
}

</mosaic_0001>

<bundles_post_ra>
// kernel: tpu_custom_call.1
= control target key start
LH: loop header
LB: loop body
LE: loop exit
PB: predicated region body
PF: predicated region fallthrough
CT: control target
= control target key end

     0   :  { %13 = vsyncpa [#allocation5], 0  ;;  %s781_s0 = inlined_call_operand.hbm [shape: f32[2], index: 0, kind: input, shape index: {}]   ;;  %s782_s1 = inlined_call_operand.hbm [shape: f32[8,32], index: 1, kind: input, shape index: {}]   ;;  %s783_s2 = inlined_call_operand.hbm [shape: f32[32,128], index: 2, kind: input, shape index: {}]   ;;  %s784_s3 = inlined_call_operand.vmem [shape: f32[1,128], index: 3, kind: input, shape index: {}]   ;;  %s785_s4 = inlined_call_operand.hbm [shape: f32[128,128], index: 4, kind: input, shape index: {}]   ;;  %s786_s5 = inlined_call_operand.vmem [shape: f32[1,128], index: 5, kind: input, shape index: {}]   ;;  %s787_s6 = inlined_call_operand.hbm [shape: f32[128,128], index: 6, kind: input, shape index: {}]   ;;  %s788_s7 = inlined_call_operand.vmem [shape: f32[1,128], index: 7, kind: input, shape index: {}]   ;;  %s789_s8 = inlined_call_operand.hbm [shape: f32[8,128], index: 8, kind: output, shape index: {}]  }
   0x1   :  { %14 = vsyncpa [#allocation3], 0 }
   0x2   :  { %15 = vsyncpa [#allocation8], 0 }
   0x3   :  { %16 = vsyncpa [#allocation11], 0 }
   0x4   :  { %17 = vsyncpa [#allocation4], 0  ;;  %s648_s27 = smov [#allocation7]  }
   0x5   :  { %s41_s28 = sshll.u32 %s648_s27, 4  ;;  %s42_s28 = int_to_ptr.vmem [resolvable:$true] %s41_s28 }
   0x6   :  { %s538_s29 = scalar_lea.vmem %s42_s28, 512  ;;  %p543_p1 = scmp.lt.s32.totalorder %s42_s28, %s42_s28 }
   0x7   :  { %p539_p0 = scmp.ne.s32.totalorder %s42_s28, %s538_s29  ;;  %p544_p2 = scmp.lt.s32.totalorder %s538_s29, %s538_s29 }
   0x9   :  { %p545_p3 = por %p544_p2, %p543_p1 }
   0xb   :  { %p546_p4 = pnand %p545_p3, %p539_p0 }
   0xd   :  { %549 = shalt.err (!%p546_p4)
}
   0xe   :  { %s649_s30 = smov 128   ;;  %s650_s9 = smov 8  }
   0xf   :  { %47 = dma.hbm_to_vmem [thread:$0]  %s783_s2, 512, %s42_s28, [#allocation8], %s649_s30, %s649_s30, %s650_s9  }
  0x10   :  { %s651_s12 = smov [#allocation2]   ;;  %s652_s15 = smov [#allocation6]  }
  0x11   :  { %25 = dma.hbm_to_smem %s781_s0, 16, %s651_s12, [#allocation5]  }
  0x12   :  { %s32_s16 = sshll.u32 %s652_s15, 4  ;;  %s653_s17 = smov [#allocation9]   ;;  %s33_s16 = int_to_ptr.vmem [resolvable:$true] %s32_s16 }
  0x13   :  { %s55_s18 = sshll.u32 %s653_s17, 4  ;;  %s566_s19 = scalar_lea.vmem %s33_s16, 128  ;;  %s56_s18 = int_to_ptr.vmem [resolvable:$true] %s55_s18 }
  0x14   :  { %p567_p5 = scmp.ne.s32.totalorder %s33_s16, %s566_s19  ;;  %p571_p6 = scmp.lt.s32.totalorder %s33_s16, %s33_s16 }
  0x15   :  { %p572_p7 = scmp.lt.s32.totalorder %s566_s19, %s566_s19 }
  0x17   :  { %p573_p8 = por %p572_p7, %p571_p6 }
  0x19   :  { %p574_p9 = pnand %p573_p8, %p567_p5 }
  0x1b   :  { %577 = shalt.err (!%p574_p9)
}
  0x1c   :  { %35 = dma.hbm_to_vmem [thread:$0]  %s782_s1, 128, %s33_s16, [#allocation3]  }
  0x1d   :  { %s586_s21 = scalar_lea.vmem %s56_s18, 2048  ;;  %p591_p11 = scmp.lt.s32.totalorder %s56_s18, %s56_s18 }
  0x1e   :  { %p587_p10 = scmp.ne.s32.totalorder %s56_s18, %s586_s21  ;;  %p592_p12 = scmp.lt.s32.totalorder %s586_s21, %s586_s21 }
  0x20   :  { %p593_p13 = por %p592_p12, %p591_p11 }
  0x22   :  { %p594_p0 = pnand %p593_p13, %p587_p10 }
  0x24   :  { %597 = shalt.err (!%p594_p0)
}
  0x25   :  { %61 = dma.hbm_to_vmem [thread:$0]  %s785_s4, 2048, %s56_s18, [#allocation8], %s649_s30, %s649_s30, %s650_s9  }
  0x26   :  { %s654_s23 = smov [#allocation10]  }
  0x27   :  { %s69_s24 = sshll.u32 %s654_s23, 4  ;;  %s70_s24 = int_to_ptr.vmem [resolvable:$true] %s69_s24 }
  0x28   :  { %s606_s25 = scalar_lea.vmem %s70_s24, 2048  ;;  %p611_p2 = scmp.lt.s32.totalorder %s70_s24, %s70_s24 }
  0x29   :  { %p607_p1 = scmp.ne.s32.totalorder %s70_s24, %s606_s25  ;;  %p612_p3 = scmp.lt.s32.totalorder %s606_s25, %s606_s25 }
  0x2b   :  { %p613_p4 = por %p612_p3, %p611_p2 }
  0x2d   :  { %p614_p5 = pnand %p613_p4, %p607_p1 }
  0x2f   :  { %617 = shalt.err (!%p614_p5)
}
  0x30   :  { %75 = dma.hbm_to_vmem [thread:$0]  %s787_s6, 2048, %s70_s24, [#allocation11], %s649_s30, %s649_s30, %s650_s9  }
  0x31   :  { %638 = dma.done.wait [#allocation5], 16  }
  0x32   :  { %639 = vsyncadd [#allocation5], 4294967280 }
  0x33   :  { %640 = dma.done.wait [#allocation3], 128  }
  0x34   :  { %641 = vsyncadd [#allocation3], 4294967168 }
  0x35   :  { %642 = dma.done.wait [#allocation8], 2560  }
  0x36   :  { %643 = vsyncadd [#allocation8], 4294964736 }
  0x37   :  { %644 = dma.done.wait [#allocation11], 2048  }
  0x38   :  { %645 = vsyncadd [#allocation11], 4294965248 }
  0x39   :  { %93 = sfence }
  0x3a   :  { %v100_v0 = vld [vmem:[#allocation7 + $0x18] sm:$0xff]  ;;  %v655_v1 = vmov 0.0   ;;  %v99_v2 = vld [vmem:[#allocation7 + $0x10] sm:$0xff]  ;;  %vm656_vm0 = vmmov 0   ;;  %v98_v5 = vld [vmem:[#allocation7 + $0x8] sm:$0xff]  ;;  %vm108_vm1 = vcmask 261120  }
  0x3b   :  { %439 = vmatprep.subr.mxu0 %v655_v1  ;;  %447 = vmatprep.mubr.msk.f32.mxu0 %vm656_vm0, %v655_v1  ;;  %v201_v3 = vld [vmem:[#allocation9 + $0x78] sm:$0xff]  ;;  %v200_v4 = vld [vmem:[#allocation9 + $0x70] sm:$0xff]  ;;  %v199_v6 = vld [vmem:[#allocation9 + $0x68] sm:$0xff]  ;;  %s94_s4 = sld [smem:[#allocation2]]  ;;  %s657_s10 = smov [#allocation12]  }
  0x3c   :  { %440 = vmatpush3.msra.mxu0 %v100_v0  ;;  %450 = vmatprep.subr.mxu1 %v655_v1  ;;  %v97_v7 = vld [vmem:[#allocation7] sm:$0xff]  ;;  %v96_v8 = vld [vmem:[#allocation6] sm:$0xff]  ;;  %v196_v11 = vld [vmem:[#allocation9 + $0x50] sm:$0xff]  ;;  %s395_s28 = sld [smem:[#allocation2 + $0x1]]  ;;  %s383_s11 = sshll.u32 %s657_s10, 4  ;;  %s384_s11 = int_to_ptr.vmem [resolvable:$true] %s383_s11 }
  0x3d   :  { %441 = vmatprep.subr.mxu0 %v655_v1  ;;  %451 = vmatpush3.msra.mxu1 %v201_v3  ;;  %v198_v9 = vld [vmem:[#allocation9 + $0x60] sm:$0xff]  ;;  %v197_v10 = vld [vmem:[#allocation9 + $0x58] sm:$0xff]  ;;  %v195_v12 = vld [vmem:[#allocation9 + $0x48] sm:$0xff]  ;;  %p623_p7 = scmp.lt.s32.totalorder %s384_s11, %s384_s11 }
  0x3e   :  { %442 = vmatpush3.msra.mxu0 %v99_v2  ;;  %452 = vmatprep.subr.mxu1 %v655_v1  ;;  %v194_v13 = vld [vmem:[#allocation9 + $0x40] sm:$0xff]  ;;  %v193_v14 = vld [vmem:[#allocation9 + $0x38] sm:$0xff]  ;;  %v192_v15 = vld [vmem:[#allocation9 + $0x30] sm:$0xff] }
  0x3f   :  { %443 = vmatprep.subr.mxu0 %v655_v1  ;;  %453 = vmatpush3.msra.mxu1 %v200_v4  ;;  %v191_v16 = vld [vmem:[#allocation9 + $0x28] sm:$0xff]  ;;  %v190_v17 = vld [vmem:[#allocation9 + $0x20] sm:$0xff]  ;;  %v189_v18 = vld [vmem:[#allocation9 + $0x18] sm:$0xff] }
  0x40   :  { %444 = vmatpush3.msra.mxu0 %v98_v5  ;;  %454 = vmatprep.subr.mxu1 %v655_v1  ;;  %v188_v19 = vld [vmem:[#allocation9 + $0x10] sm:$0xff]  ;;  %v187_v20 = vld [vmem:[#allocation9 + $0x8] sm:$0xff]  ;;  %v186_v21 = vld [vmem:[#allocation9] sm:$0xff] }
  0x41   :  { %445 = vmatprep.subr.mxu0 %v655_v1  ;;  %455 = vmatpush3.msra.mxu1 %v199_v6  ;;  %v298_v22 = vld [vmem:[#allocation10 + $0x78] sm:$0xff]  ;;  %v297_v23 = vld [vmem:[#allocation10 + $0x70] sm:$0xff]  ;;  %v296_v24 = vld [vmem:[#allocation10 + $0x68] sm:$0xff]  ;;  %v183_v37 = vstv %s94_s4 }
  0x42   :  { %446 = vmatpush3.msra.mxu0 %v97_v7  ;;  %456 = vmatprep.subr.mxu1 %v655_v1  ;;  %v295_v25 = vld [vmem:[#allocation10 + $0x60] sm:$0xff]  ;;  %v294_v26 = vld [vmem:[#allocation10 + $0x58] sm:$0xff]  ;;  %v293_v27 = vld [vmem:[#allocation10 + $0x50] sm:$0xff]  ;;  %v280_v47 = vstv %s395_s28 }
  0x43   :  { %448 = vmatmul.mubr.msk.f32.vlgmr.msra.gmra.mxu0 %vm108_vm1, %v96_v8  ;;  %457 = vmatpush3.msra.mxu1 %v198_v9  ;;  %v292_v28 = vld [vmem:[#allocation10 + $0x48] sm:$0xff]  ;;  %v291_v29 = vld [vmem:[#allocation10 + $0x40] sm:$0xff]  ;;  %v290_v30 = vld [vmem:[#allocation10 + $0x38] sm:$0xff] }
  0x44   :  { %458 = vmatprep.subr.mxu1 %v655_v1  ;;  %482 = vmatprep.mubr.msk.f32.mxu1 %vm656_vm0, %v655_v1  ;;  %v289_v31 = vld [vmem:[#allocation10 + $0x30] sm:$0xff]  ;;  %v288_v32 = vld [vmem:[#allocation10 + $0x28] sm:$0xff]  ;;  %v287_v33 = vld [vmem:[#allocation10 + $0x20] sm:$0xff] }
  0x45   :  { %459 = vmatpush3.msra.mxu1 %v197_v10  ;;  %485 = vmatprep.subr.mxu0 %v655_v1  ;;  %v286_v34 = vld [vmem:[#allocation10 + $0x18] sm:$0xff]  ;;  %v285_v42 = vld [vmem:[#allocation10 + $0x10] sm:$0xff]  ;;  %v284_v43 = vld [vmem:[#allocation10 + $0x8] sm:$0xff] }
  0x46   :  { %460 = vmatprep.subr.mxu1 %v655_v1  ;;  %517 = vmatprep.mubr.msk.f32.mxu0 %vm656_vm0, %v655_v1  ;;  %v396_v35 = vld [vmem:[%s784_s3] ss:$0 sm:$0xff]  ;;  %v283_v44 = vld [vmem:[#allocation10] sm:$0xff] }
  0x47   :  { %461 = vmatpush3.msra.mxu1 %v196_v11  ;;  %486 = vmatpush3.msra.mxu0 %v298_v22  ;;  %v398_v45 = vld [vmem:[%s786_s5] ss:$0 sm:$0xff]  ;;  %s618_s5 = scalar_lea.vmem %s384_s11, 128 }
  0x48   :  { %462 = vmatprep.subr.mxu1 %v655_v1  ;;  %487 = vmatprep.subr.mxu0 %v655_v1  ;;  %v399_v52 = vld [vmem:[%s788_s7] ss:$0 sm:$0xff]  ;;  %p619_p6 = scmp.ne.s32.totalorder %s384_s11, %s618_s5  ;;  %p624_p8 = scmp.lt.s32.totalorder %s618_s5, %s618_s5 }
  0x49   :  { %463 = vmatpush3.msra.mxu1 %v195_v12  ;;  %488 = vmatpush3.msra.mxu0 %v297_v23 }
  0x4a   :  { %464 = vmatprep.subr.mxu1 %v655_v1  ;;  %489 = vmatprep.subr.mxu0 %v655_v1  ;;  %p625_p9 = por %p624_p8, %p623_p7 }
  0x4b   :  { %465 = vmatpush3.msra.mxu1 %v194_v13  ;;  %490 = vmatpush3.msra.mxu0 %v296_v24 }
  0x4c   :  { %466 = vmatprep.subr.mxu1 %v655_v1  ;;  %491 = vmatprep.subr.mxu0 %v655_v1  ;;  %p626_p10 = pnand %p625_p9, %p619_p6 }
  0x4d   :  { %467 = vmatpush3.msra.mxu1 %v193_v14  ;;  %492 = vmatpush3.msra.mxu0 %v295_v25 }
  0x4e   :  { %468 = vmatprep.subr.mxu1 %v655_v1  ;;  %493 = vmatprep.subr.mxu0 %v655_v1 }
  0x4f   :  { %469 = vmatpush3.msra.mxu1 %v192_v15  ;;  %494 = vmatpush3.msra.mxu0 %v294_v26 }
  0x50   :  { %470 = vmatprep.subr.mxu1 %v655_v1  ;;  %495 = vmatprep.subr.mxu0 %v655_v1 }
  0x51   :  { %471 = vmatpush3.msra.mxu1 %v191_v16  ;;  %496 = vmatpush3.msra.mxu0 %v293_v27 }
  0x52   :  { %472 = vmatprep.subr.mxu1 %v655_v1  ;;  %497 = vmatprep.subr.mxu0 %v655_v1 }
  0x53   :  { %473 = vmatpush3.msra.mxu1 %v190_v17  ;;  %498 = vmatpush3.msra.mxu0 %v292_v28 }
  0x54   :  { %474 = vmatprep.subr.mxu1 %v655_v1  ;;  %499 = vmatprep.subr.mxu0 %v655_v1 }
  0x55   :  { %475 = vmatpush3.msra.mxu1 %v189_v18  ;;  %500 = vmatpush3.msra.mxu0 %v291_v29 }
  0x56   :  { %476 = vmatprep.subr.mxu1 %v655_v1  ;;  %501 = vmatprep.subr.mxu0 %v655_v1 }
  0x57   :  { %477 = vmatpush3.msra.mxu1 %v188_v19  ;;  %502 = vmatpush3.msra.mxu0 %v290_v30 }
  0x58   :  { %478 = vmatprep.subr.mxu1 %v655_v1  ;;  %503 = vmatprep.subr.mxu0 %v655_v1 }
  0x59   :  { %479 = vmatpush3.msra.mxu1 %v187_v20  ;;  %504 = vmatpush3.msra.mxu0 %v289_v31 }
  0x5a   :  { %480 = vmatprep.subr.mxu1 %v655_v1  ;;  %505 = vmatprep.subr.mxu0 %v655_v1 }
  0x5b   :  { %481 = vmatpush3.msra.mxu1 %v186_v21  ;;  %506 = vmatpush3.msra.mxu0 %v288_v32 }
  0x5c   :  { %507 = vmatprep.subr.mxu0 %v655_v1 }
  0x5d   :  { %508 = vmatpush3.msra.mxu0 %v287_v33 }
  0x5e   :  { %509 = vmatprep.subr.mxu0 %v655_v1 }
  0x5f   :  { %510 = vmatpush3.msra.mxu0 %v286_v34 }
  0x60   :  { %511 = vmatprep.subr.mxu0 %v655_v1 }
  0x61   :  { %512 = vmatpush3.msra.mxu0 %v285_v42 }
  0x62   :  { %513 = vmatprep.subr.mxu0 %v655_v1 }
  0x63   :  { %514 = vmatpush3.msra.mxu0 %v284_v43 }
  0x64   :  { %515 = vmatprep.subr.mxu0 %v655_v1 }
  0x65   :  { %516 = vmatpush3.msra.mxu0 %v283_v44 }
 0x103   :  { %v178_v36 = vpop.f32.mrf.mxu0 }
 0x104   :  { %v179_v38 = vadd.f32 %v396_v35, %v178_v36 }
 0x105   :  { %v449_v39 = vpop.f32.mrf.mxu0 }
 0x106   :  { %v184_v40 = vmul.f32 %v183_v37, %v179_v38  ;;  %vm182_vm2 = vcmp.ge.f32.partialorder %v179_v38, 0.0 }
 0x108   :  { %v185_v41 = vsel %vm182_vm2, %v179_v38, %v184_v40 }
 0x109   :  { %483 = vmatmul.mubr.f32.vlgmr.msra.gmra.mxu1 %v185_v41 }
 0x1c9   :  { %v275_v46 = vpop.f32.mrf.mxu1 }
 0x1ca   :  { %v276_v48 = vadd.f32 %v398_v45, %v275_v46 }
 0x1cb   :  { %v484_v49 = vpop.f32.mrf.mxu1 }
 0x1cc   :  { %vm279_vm3 = vcmp.ge.f32.partialorder %v276_v48, 0.0  ;;  %v281_v50 = vmul.f32 %v280_v47, %v276_v48 }
 0x1ce   :  { %v282_v51 = vsel %vm279_vm3, %v276_v48, %v281_v50 }
 0x1cf   :  { %518 = vmatmul.mubr.f32.vlgmr.msra.gmra.mxu0 %v282_v51 }
 0x28f   :  { %v372_v53 = vpop.f32.mrf.mxu0 }
 0x290   :  { %v373_v54 = vadd.f32 %v399_v52, %v372_v53 }
 0x291   :  { %v519_v55 = vpop.f32.mrf.mxu0 }
 0x292   :  { %376 = vst [vmem:[#allocation12] sm:$0xff] %v373_v54 }
 0x293   :  { %629 = shalt.err (!%p626_p10)
}
 0x294   :  { %386 = dma.vmem_to_hbm [thread:$0]  %s384_s11, 128, %s789_s8, [#allocation4]  }
 0x295   :  { %646 = dma.done.wait [#allocation4], 128  }
 0x296   :  { %647 = vsyncadd [#allocation4], 4294967168 }
 0x297   :  { %390 = vsyncpa [#allocation3], 1 }
 0x298   :  { %391 = vsyncpa [#allocation8], 1 }
 0x299   :  { %392 = vsyncpa [#allocation11], 1 }
 0x29a   :  { %393 = vsyncpa [#allocation4], 1 }
 0x29b   :  { %394 = vsyncpa [#allocation5], 1 }

</bundles_post_ra>
